<compile_context>
chip_gen: v6e
topology: v6e:2x2x1
jax: 0.10.0
libtpu: 0.0.40
codegen_flags: <defaults>
</compile_context>

<pallas_src>
import functools

import jax
import jax.numpy as jnp
from jax.experimental import pallas as pl
from jax.experimental.pallas import tpu as pltpu

_LANES = 128
_VMEM_LIMIT = 48 * 1024 * 1024   # raise scoped VMEM explicitly (v5e default 16 MiB)


def _round_up(x, m):
    return ((x + m - 1) // m) * m


def _plan_rows(n):
    """Pick (n_pad, row_tile, contraction_tile) for the node dimension."""
    if n <= 256:
        n_pad = _round_up(n, 8)
        return n_pad, n_pad, n_pad          # single block, full-dim tiles
    tm = 256                                # output-row tile
    tk = 512                                # N-contraction tile (256-aligned for v6e MXU)
    n_pad = _round_up(n, max(tm, tk))
    return n_pad, tm, tk


# ----------------------------------------------------------------------------
# Kernel 1: H = X @ W   (feature transform, small matmul)
# ----------------------------------------------------------------------------
def _xw_kernel(x_ref, w_ref, o_ref):
    o_ref[...] = jnp.dot(x_ref[...], w_ref[...],
                         preferred_element_type=jnp.float32).astype(o_ref.dtype)


def _feature_matmul(x, w, *, tm):
    n_pad, fin_pad = x.shape
    fout_pad = w.shape[1]
    return pl.pallas_call(
        _xw_kernel,
        out_shape=jax.ShapeDtypeStruct((n_pad, fout_pad), x.dtype),
        grid_spec=pltpu.PrefetchScalarGridSpec(
            num_scalar_prefetch=0,
            grid=(n_pad // tm,),
            in_specs=[pl.BlockSpec((tm, fin_pad), lambda i: (i, 0)),
                      pl.BlockSpec((fin_pad, fout_pad), lambda i: (0, 0))],
            out_specs=pl.BlockSpec((tm, fout_pad), lambda i: (i, 0))),
        compiler_params=pltpu.CompilerParams(
            dimension_semantics=("parallel",),
            vmem_limit_bytes=_VMEM_LIMIT),
    )(x, w)


# ----------------------------------------------------------------------------
# Kernel 2: Z = adj @ H + b   (dominant N^2 matmul, tiled with accumulator)
# ----------------------------------------------------------------------------
def _aggregate_kernel(adj_ref, h_ref, b_ref, o_ref, acc_ref, *, fuse_relu):
    k = pl.program_id(1)

    @pl.when(k == 0)
    def _init():
        acc_ref[...] = jnp.zeros_like(acc_ref)

    acc_ref[...] += jnp.dot(adj_ref[...], h_ref[...],
                            preferred_element_type=jnp.float32)

    @pl.when(k == pl.num_programs(1) - 1)
    def _writeback():
        z = acc_ref[...] + b_ref[...]          # bias broadcast once, at writeback
        if fuse_relu:
            z = jnp.maximum(z, 0.0)
        o_ref[...] = z.astype(o_ref.dtype)


def _graph_aggregate(adj, h, b, *, tm, tk, fuse_relu, out_dtype):
    n_pad = adj.shape[0]
    fout_pad = h.shape[1]
    kern = functools.partial(_aggregate_kernel, fuse_relu=fuse_relu)
    return pl.pallas_call(
        kern,
        out_shape=jax.ShapeDtypeStruct((n_pad, fout_pad), out_dtype),
        grid_spec=pltpu.PrefetchScalarGridSpec(
            num_scalar_prefetch=0,
            grid=(n_pad // tm, n_pad // tk),
            in_specs=[pl.BlockSpec((tm, tk), lambda i, k: (i, k)),
                      pl.BlockSpec((tk, fout_pad), lambda i, k: (k, 0)),
                      pl.BlockSpec((1, fout_pad), lambda i, k: (0, 0))],
            out_specs=pl.BlockSpec((tm, fout_pad), lambda i, k: (i, 0)),
            scratch_shapes=[pltpu.VMEM((tm, fout_pad), jnp.float32)]),
        compiler_params=pltpu.CompilerParams(
            dimension_semantics=("parallel", "arbitrary"),
            vmem_limit_bytes=_VMEM_LIMIT),
    )(adj, h, b)


# ----------------------------------------------------------------------------
# Kernel 3: global PairNorm statistics (column sums over the *real* rows)
# ----------------------------------------------------------------------------
def _stats_kernel(z_ref, stats_ref, *, tm, n_real):
    i = pl.program_id(0)

    @pl.when(i == 0)
    def _init():
        stats_ref[...] = jnp.zeros_like(stats_ref)

    z = z_ref[...]
    rows = jax.lax.broadcasted_iota(jnp.int32, z.shape, 0) + i * tm
    zm = jnp.where(rows < n_real, z, 0.0)        # mask padded rows
    col_sum = jnp.sum(zm, axis=0, keepdims=True)
    col_ssq = jnp.sum(zm * zm, axis=0, keepdims=True)
    pad = jnp.zeros((6, z.shape[1]), jnp.float32)
    stats_ref[...] += jnp.concatenate([col_sum, col_ssq, pad], axis=0)


def _pairnorm_stats(z, *, tm, n_real):
    n_pad, f_pad = z.shape
    kern = functools.partial(_stats_kernel, tm=tm, n_real=n_real)
    return pl.pallas_call(
        kern,
        out_shape=jax.ShapeDtypeStruct((8, f_pad), jnp.float32),
        grid_spec=pltpu.PrefetchScalarGridSpec(
            num_scalar_prefetch=0,
            grid=(n_pad // tm,),
            in_specs=[pl.BlockSpec((tm, f_pad), lambda i: (i, 0))],
            out_specs=pl.BlockSpec((8, f_pad), lambda i: (0, 0))),
        compiler_params=pltpu.CompilerParams(
            dimension_semantics=("arbitrary",),
            vmem_limit_bytes=_VMEM_LIMIT),
    )(z)


# ----------------------------------------------------------------------------
# Kernel 4: PairNorm apply + ReLU (row-tiled, uses global stats)
# ----------------------------------------------------------------------------
def _pairnorm_relu_kernel(z_ref, stats_ref, o_ref, *, mode, scale, inv_n):
    z = z_ref[...]
    col_mean = stats_ref[0:1, :] * inv_n                       # (1, F)
    if mode == 'PN':
        zc = z - col_mean
        # mean_i ||z_i - mu||^2 = sum_j col_ssq_j / N - sum_j mu_j^2
        mean_sq = (jnp.sum(stats_ref[1:2, :], keepdims=True) * inv_n
                   - jnp.sum(col_mean * col_mean, keepdims=True))
        out = (scale * zc) * jax.lax.rsqrt(1e-6 + mean_sq)
    elif mode == 'PN-SI':
        zc = z - col_mean
        rn2 = 1e-6 + jnp.sum(zc * zc, axis=1, keepdims=True)
        out = (scale * zc) * jax.lax.rsqrt(rn2)
    elif mode == 'PN-SCS':
        rn2 = 1e-6 + jnp.sum(z * z, axis=1, keepdims=True)
        out = (scale * z) * jax.lax.rsqrt(rn2) - col_mean
    else:                                                      # 'None'
        out = z
    o_ref[...] = jnp.maximum(out, 0.0).astype(o_ref.dtype)


def _pairnorm_relu(z, stats, *, tm, mode, scale, n_real, out_dtype):
    n_pad, f_pad = z.shape
    kern = functools.partial(_pairnorm_relu_kernel, mode=mode, scale=scale,
                             inv_n=1.0 / float(n_real))
    return pl.pallas_call(
        kern,
        out_shape=jax.ShapeDtypeStruct((n_pad, f_pad), out_dtype),
        grid_spec=pltpu.PrefetchScalarGridSpec(
            num_scalar_prefetch=0,
            grid=(n_pad // tm,),
            in_specs=[pl.BlockSpec((tm, f_pad), lambda i: (i, 0)),
                      pl.BlockSpec((8, f_pad), lambda i: (0, 0))],
            out_specs=pl.BlockSpec((tm, f_pad), lambda i: (i, 0))),
        compiler_params=pltpu.CompilerParams(
            dimension_semantics=("parallel",),
            vmem_limit_bytes=_VMEM_LIMIT),
    )(z, stats)


# ----------------------------------------------------------------------------
# DeepGCN module (parameter init + forward wrapper)
# ----------------------------------------------------------------------------
class DeepGCNPallas:
    def __init__(self, nfeat, nhid, nclass, dropout, nlayer=2, residual=0,
                 norm_mode='None', norm_scale=1, adj_dtype=jnp.float32,
                 key=None):
        assert nlayer >= 1
        assert norm_mode in ['None', 'PN', 'PN-SI', 'PN-SCS']
        if key is None:
            key = jax.random.PRNGKey(0)
        self.nfeat, self.nhid, self.nclass = nfeat, nhid, nclass
        self.norm_mode = norm_mode
        self.norm_scale = float(norm_scale)
        self.skip = residual
        self.dropout = dropout            # identity at inference
        self.adj_dtype = adj_dtype        # bf16 halves adjacency HBM traffic

        self.fin_pad = _round_up(nfeat, _LANES)
        self.nhid_pad = _round_up(nhid, _LANES)
        self.nclass_pad = _round_up(nclass, _LANES)

        def pad_wb(w, b, fin_p, fout_p):
            wp = jnp.zeros((fin_p, fout_p), jnp.float32)
            wp = wp.at[:w.shape[0], :w.shape[1]].set(w)
            bp = jnp.zeros((1, fout_p), jnp.float32).at[:, :b.shape[1]].set(b)
            return wp, bp

        self.hidden_params = []      # unpadded (pure-JAX reference)
        self.hidden_params_pad = []  # lane-padded (fed to kernels)
        for i in range(nlayer - 1):
            fin = nfeat if i == 0 else nhid
            fin_p = self.fin_pad if i == 0 else self.nhid_pad
            key, kw, kb = jax.random.split(key, 3)
            stdv = 1.0 / jnp.sqrt(float(nhid))
            w = jax.random.uniform(kw, (fin, nhid), jnp.float32, -stdv, stdv)
            b = jax.random.uniform(kb, (1, nhid), jnp.float32, -stdv, stdv)
            self.hidden_params.append((w, b))
            self.hidden_params_pad.append(pad_wb(w, b, fin_p, self.nhid_pad))

        fin_out = nfeat if nlayer == 1 else nhid
        fin_out_p = self.fin_pad if nlayer == 1 else self.nhid_pad
        key, kw, kb = jax.random.split(key, 3)
        stdv = 1.0 / jnp.sqrt(float(nclass))
        self.w_out = jax.random.uniform(kw, (fin_out, nclass), jnp.float32,
                                        -stdv, stdv)
        self.b_out = jax.random.uniform(kb, (1, nclass), jnp.float32,
                                        -stdv, stdv)
        self.w_out_pad, self.b_out_pad = pad_wb(self.w_out, self.b_out,
                                                fin_out_p, self.nclass_pad)

    def __call__(self, x, adj):
        n = x.shape[0]
        n_pad, tm, tk = _plan_rows(n)
        cd = self.adj_dtype

        xp = jnp.pad(x, ((0, n_pad - n), (0, self.fin_pad - x.shape[1]))).astype(cd)
        adjp = jnp.pad(adj, ((0, n_pad - n), (0, n_pad - n))).astype(cd)

        cur, x_old = xp, 0.0
        for i, (w, b) in enumerate(self.hidden_params_pad):
            # TODO(synk): training-mode dropout (random mask) is not modeled.
            h = _feature_matmul(cur, w.astype(cd), tm=tm)
            if self.norm_mode == 'None':
                cur = _graph_aggregate(adjp, h, b, tm=tm, tk=tk,
                                       fuse_relu=True, out_dtype=cd)
            else:
                z = _graph_aggregate(adjp, h, b, tm=tm, tk=tk,
                                     fuse_relu=False, out_dtype=jnp.float32)
                stats = _pairnorm_stats(z, tm=tm, n_real=n)
                cur = _pairnorm_relu(z, stats, tm=tm, mode=self.norm_mode,
                                     scale=self.norm_scale, n_real=n,
                                     out_dtype=cd)
            if self.skip > 0 and i % self.skip == 0:
                cur = cur + x_old
                x_old = cur

        h = _feature_matmul(cur, self.w_out_pad.astype(cd), tm=tm)
        z = _graph_aggregate(adjp, h, self.b_out_pad, tm=tm, tk=tk,
                             fuse_relu=False, out_dtype=jnp.float32)
        return z[:n, :self.nclass]

    # pure-JAX reference for correctness checking
    def reference(self, x, adj):
        def pairnorm(h):
            if self.norm_mode == 'None':
                return h
            col_mean = jnp.mean(h, axis=0)
            if self.norm_mode == 'PN':
                h = h - col_mean
                rn = jnp.sqrt(1e-6 + jnp.mean(jnp.sum(h ** 2, axis=1)))
                return self.norm_scale * h / rn
            if self.norm_mode == 'PN-SI':
                h = h - col_mean
                rn = jnp.sqrt(1e-6 + jnp.sum(h ** 2, axis=1, keepdims=True))
                return self.norm_scale * h / rn
            rn = jnp.sqrt(1e-6 + jnp.sum(h ** 2, axis=1, keepdims=True))
            return self.norm_scale * h / rn - col_mean

        x_old = 0.0
        for i, (w, b) in enumerate(self.hidden_params):
            x = jax.nn.relu(pairnorm(adj @ (x @ w) + b))
            if self.skip > 0 and i % self.skip == 0:
                x = x + x_old
                x_old = x
        return adj @ (x @ self.w_out) + self.b_out


# ----------------------------------------------------------------------------
# Demo
# ----------------------------------------------------------------------------
if __name__ == "__main__":
    key = jax.random.PRNGKey(0)

    def make_graph(k, n, nfeat):
        kx, ka = jax.random.split(k)
        x = jax.random.normal(kx, (n, nfeat), jnp.float32)
        a = (jax.random.uniform(ka, (n, n)) > 0.5).astype(jnp.float32)
        a = ((a + a.T) > 0).astype(jnp.float32) + jnp.eye(n, dtype=jnp.float32)
        return x, a / jnp.sum(a, axis=1, keepdims=True)

    NFEAT, NHID, NCLASS = 32, 32, 8
    kg, kp, kg2, kp2 = jax.random.split(key, 4)

    # --- small graph: single-block path, all PairNorm modes + residual -------
    x, adj = make_graph(kg, 16, NFEAT)
    for mode, resid in [('PN', 0), ('PN-SI', 1), ('PN-SCS', 0), ('None', 0)]:
        model = DeepGCNPallas(NFEAT, NHID, NCLASS, dropout=0.0, nlayer=3,
                              residual=resid, norm_mode=mode, norm_scale=1.0,
                              key=kp)
        out = model(x, adj)
        jax.block_until_ready(out)
        ref = model.reference(x, adj)
        assert out.shape == (16, NCLASS)
        assert jnp.allclose(out, ref, atol=5e-4, rtol=5e-4), \
            f"mismatch ({mode}, skip={resid})"

    # --- larger graph: exercises the (parallel, arbitrary) tiled grid --------
    x2, adj2 = make_graph(kg2, 640, NFEAT)
    model = DeepGCNPallas(NFEAT, NHID, NCLASS, dropout=0.0, nlayer=2,
                          residual=0, norm_mode='PN', norm_scale=1.0, key=kp2)
    out2 = model(x2, adj2)
    jax.block_until_ready(out2)
    ref2 = model.reference(x2, adj2)
    assert jnp.allclose(out2, ref2, atol=2e-3, rtol=2e-3), "mismatch (tiled f32)"

    # --- bf16 adjacency: halves the dominant N^2 HBM traffic -----------------
    model_bf16 = DeepGCNPallas(NFEAT, NHID, NCLASS, dropout=0.0, nlayer=2,
                               residual=0, norm_mode='PN', norm_scale=1.0,
                               adj_dtype=jnp.bfloat16, key=kp2)
    out3 = model_bf16(x2, adj2)
    jax.block_until_ready(out3)
    ref3 = model_bf16.reference(x2, adj2)
    assert jnp.allclose(out3, ref3, atol=6e-2, rtol=6e-2), "mismatch (bf16 adj)"

    print("KERNEL_OK")
</pallas_src>

<mosaic_0001>
module attributes {stable_mosaic.version = 11 : i64} {
  func.func @_xw_kernel(%arg0: i32, %arg1: memref<16x128xf32, #tpu.memory_space<vmem>>, %arg2: memref<128x128xf32, #tpu.memory_space<vmem>>, %arg3: memref<16x128xf32, #tpu.memory_space<vmem>>) attributes {dimension_semantics = [#tpu.dimension_semantics<parallel>], iteration_bounds = array<i64: 1>, scalar_prefetch = 0 : i64, scratch_operands = 0 : i64, tpu.core_type = #tpu.core_type<tc>, window_params = [{transform_indices = @transform_0, window_bounds = array<i64: 16, 128>}, {pipeline_mode = #tpu.pipeline_mode<synchronous>, transform_indices = @transform_1, window_bounds = array<i64: 128, 128>}, {transform_indices = @transform_2, window_bounds = array<i64: 16, 128>}]} {
    %c0 = arith.constant 0 : index
    %c0_0 = arith.constant 0 : index
    %0 = vector.load %arg1[%c0, %c0_0] : memref<16x128xf32, #tpu.memory_space<vmem>>, vector<16x128xf32>
    %c0_1 = arith.constant 0 : index
    %c0_2 = arith.constant 0 : index
    %1 = vector.load %arg2[%c0_1, %c0_2] : memref<128x128xf32, #tpu.memory_space<vmem>>, vector<128x128xf32>
    %cst = arith.constant dense<0.000000e+00> : vector<16x128xf32>
    %2 = tpu.matmul %0, %1, %cst {dimension_numbers = #tpu.dot_dimension_numbers<[1], [0], [0], [1], [0, 0, 1, 1], [], []>} : vector<16x128xf32>, vector<128x128xf32>, vector<16x128xf32> -> vector<16x128xf32>
    %c0_3 = arith.constant 0 : index
    %c0_4 = arith.constant 0 : index
    %3 = vector.load %arg3[%c0_3, %c0_4] : memref<16x128xf32, #tpu.memory_space<vmem>>, vector<16x128xf32>
    tpu.vector_store %arg3[%c0_3, %c0_4], %2 {strides = array<i32>} : memref<16x128xf32, #tpu.memory_space<vmem>>, vector<16x128xf32>,
    return
  }
  func.func @transform_0(%arg0: i32) -> (i32, i32) {
    %c0_i32 = arith.constant 0 : i32
    %c0_i32_0 = arith.constant 0 : i32
    return %arg0, %c0_i32 : i32, i32
  }
  func.func @transform_1(%arg0: i32) -> (i32, i32) {
    %c0_i32 = arith.constant 0 : i32
    %c0_i32_0 = arith.constant 0 : i32
    %c0_i32_1 = arith.constant 0 : i32
    return %c0_i32, %c0_i32_0 : i32, i32
  }
  func.func @transform_2(%arg0: i32) -> (i32, i32) {
    %c0_i32 = arith.constant 0 : i32
    %c0_i32_0 = arith.constant 0 : i32
    return %arg0, %c0_i32 : i32, i32
  }
}

</mosaic_0001>

<bundles_post_ra>
// kernel: tpu_custom_call.1
= control target key start
LH: loop header
LB: loop body
LE: loop exit
PB: predicated region body
PF: predicated region fallthrough
CT: control target
= control target key end

     0   :  { %7 = vsyncpa [#allocation3], 0  ;;  %s315_s0 = inlined_call_operand.hbm [shape: f32[16,128], index: 0, kind: input, shape index: {}]   ;;  %s316_s1 = inlined_call_operand.hbm [shape: f32[128,128], index: 1, kind: input, shape index: {}]   ;;  %s317_s2 = inlined_call_operand.hbm [shape: f32[16,128], index: 2, kind: output, shape index: {}]  }
   0x1   :  { %8 = vsyncpa [#allocation6], 0 }
   0x2   :  { %9 = vsyncpa [#allocation4], 0  ;;  %s277_s9 = smov [#allocation2]  }
   0x3   :  { %s15_s10 = sshll.u32 %s277_s9, 4  ;;  %s16_s10 = int_to_ptr.vmem [resolvable:$true] %s15_s10 }
   0x4   :  { %s219_s11 = scalar_lea.vmem %s16_s10, 256  ;;  %p224_p1 = scmp.lt.s32.totalorder %s16_s10, %s16_s10 }
   0x5   :  { %p220_p0 = scmp.ne.s32.totalorder %s16_s10, %s219_s11  ;;  %p225_p2 = scmp.lt.s32.totalorder %s219_s11, %s219_s11 }
   0x7   :  { %p226_p3 = por %p225_p2, %p224_p1 }
   0x9   :  { %p227_p4 = pnand %p226_p3, %p220_p0 }
   0xb   :  { %230 = shalt.err (!%p227_p4)
}
   0xc   :  { %s278_s12 = smov 128   ;;  %s279_s13 = smov 8  }
   0xd   :  { %21 = dma.hbm_to_vmem [thread:$0]  %s315_s0, 256, %s16_s10, [#allocation3], %s278_s12, %s278_s12, %s279_s13  }
   0xe   :  { %s280_s16 = smov [#allocation5]  }
   0xf   :  { %s27_s17 = sshll.u32 %s280_s16, 4  ;;  %s28_s17 = int_to_ptr.vmem [resolvable:$true] %s27_s17 }
  0x10   :  { %s239_s18 = scalar_lea.vmem %s28_s17, 2048  ;;  %p244_p6 = scmp.lt.s32.totalorder %s28_s17, %s28_s17 }
  0x11   :  { %p240_p5 = scmp.ne.s32.totalorder %s28_s17, %s239_s18  ;;  %p245_p7 = scmp.lt.s32.totalorder %s239_s18, %s239_s18 }
  0x13   :  { %p246_p8 = por %p245_p7, %p244_p6 }
  0x15   :  { %p247_p9 = pnand %p246_p8, %p240_p5 }
  0x17   :  { %250 = shalt.err (!%p247_p9)
}
  0x18   :  { %33 = dma.hbm_to_vmem [thread:$0]  %s316_s1, 2048, %s28_s17, [#allocation6], %s278_s12, %s278_s12, %s279_s13  }
  0x19   :  { %271 = dma.done.wait [#allocation3], 256  }
  0x1a   :  { %272 = vsyncadd [#allocation3], 4294967040 }
  0x1b   :  { %273 = dma.done.wait [#allocation6], 2048  }
  0x1c   :  { %274 = vsyncadd [#allocation6], 4294965248  ;;  %v57_v0 = vld [vmem:[#allocation5 + $0x78] sm:$0xff]  ;;  %v56_v1 = vld [vmem:[#allocation5 + $0x70] sm:$0xff]  ;;  %s281_s0 = smov [#allocation7]  }
  0x1d   :  { %171 = vmatprep.subr.mxu0 %v57_v0  ;;  %v55_v2 = vld [vmem:[#allocation5 + $0x68] sm:$0xff]  ;;  %v54_v3 = vld [vmem:[#allocation5 + $0x60] sm:$0xff]  ;;  %v40_v4 = vld [vmem:[#allocation2] sm:$0xff]  ;;  %s140_s1 = sshll.u32 %s281_s0, 4  ;;  %s141_s1 = int_to_ptr.vmem [resolvable:$true] %s140_s1 }
  0x1e   :  { %172 = vmatpush3.msra.mxu0 %v57_v0  ;;  %v53_v5 = vld [vmem:[#allocation5 + $0x58] sm:$0xff]  ;;  %203 = vmatprep.mubr.f32.mxu0 %v40_v4  ;;  %v52_v6 = vld [vmem:[#allocation5 + $0x50] sm:$0xff]  ;;  %v51_v7 = vld [vmem:[#allocation5 + $0x48] sm:$0xff]  ;;  %s251_s21 = scalar_lea.vmem %s141_s1, 256  ;;  %p256_p11 = scmp.lt.s32.totalorder %s141_s1, %s141_s1 }
  0x1f   :  { %173 = vmatprep.subr.mxu0 %v56_v1  ;;  %v50_v8 = vld [vmem:[#allocation5 + $0x40] sm:$0xff]  ;;  %v49_v9 = vld [vmem:[#allocation5 + $0x38] sm:$0xff]  ;;  %v48_v10 = vld [vmem:[#allocation5 + $0x30] sm:$0xff]  ;;  %p252_p10 = scmp.ne.s32.totalorder %s141_s1, %s251_s21  ;;  %p257_p12 = scmp.lt.s32.totalorder %s251_s21, %s251_s21 }
  0x20   :  { %174 = vmatpush3.msra.mxu0 %v56_v1  ;;  %v47_v11 = vld [vmem:[#allocation5 + $0x28] sm:$0xff]  ;;  %v46_v12 = vld [vmem:[#allocation5 + $0x20] sm:$0xff]  ;;  %v45_v13 = vld [vmem:[#allocation5 + $0x18] sm:$0xff] }
  0x21   :  { %175 = vmatprep.subr.mxu0 %v55_v2  ;;  %v44_v14 = vld [vmem:[#allocation5 + $0x10] sm:$0xff]  ;;  %v43_v15 = vld [vmem:[#allocation5 + $0x8] sm:$0xff]  ;;  %v42_v16 = vld [vmem:[#allocation5] sm:$0xff]  ;;  %p258_p13 = por %p257_p12, %p256_p11 }
  0x22   :  { %176 = vmatpush3.msra.mxu0 %v55_v2  ;;  %v41_v17 = vld [vmem:[#allocation2 + $0x8] sm:$0xff] }
  0x23   :  { %177 = vmatprep.subr.mxu0 %v54_v3  ;;  %p259_p0 = pnand %p258_p13, %p252_p10 }
  0x24   :  { %178 = vmatpush3.msra.mxu0 %v54_v3 }
  0x25   :  { %179 = vmatprep.subr.mxu0 %v53_v5 }
  0x26   :  { %180 = vmatpush3.msra.mxu0 %v53_v5 }
  0x27   :  { %181 = vmatprep.subr.mxu0 %v52_v6 }
  0x28   :  { %182 = vmatpush3.msra.mxu0 %v52_v6 }
  0x29   :  { %183 = vmatprep.subr.mxu0 %v51_v7 }
  0x2a   :  { %184 = vmatpush3.msra.mxu0 %v51_v7 }
  0x2b   :  { %185 = vmatprep.subr.mxu0 %v50_v8 }
  0x2c   :  { %186 = vmatpush3.msra.mxu0 %v50_v8 }
  0x2d   :  { %187 = vmatprep.subr.mxu0 %v49_v9 }
  0x2e   :  { %188 = vmatpush3.msra.mxu0 %v49_v9 }
  0x2f   :  { %189 = vmatprep.subr.mxu0 %v48_v10 }
  0x30   :  { %190 = vmatpush3.msra.mxu0 %v48_v10 }
  0x31   :  { %191 = vmatprep.subr.mxu0 %v47_v11 }
  0x32   :  { %192 = vmatpush3.msra.mxu0 %v47_v11 }
  0x33   :  { %193 = vmatprep.subr.mxu0 %v46_v12 }
  0x34   :  { %194 = vmatpush3.msra.mxu0 %v46_v12 }
  0x35   :  { %195 = vmatprep.subr.mxu0 %v45_v13 }
  0x36   :  { %196 = vmatpush3.msra.mxu0 %v45_v13 }
  0x37   :  { %197 = vmatprep.subr.mxu0 %v44_v14 }
  0x38   :  { %198 = vmatpush3.msra.mxu0 %v44_v14 }
  0x39   :  { %199 = vmatprep.subr.mxu0 %v43_v15 }
  0x3a   :  { %200 = vmatpush3.msra.mxu0 %v43_v15 }
  0x3b   :  { %201 = vmatprep.subr.mxu0 %v42_v16 }
  0x3c   :  { %202 = vmatpush3.msra.mxu0 %v42_v16 }
  0x3d   :  { %204 = vmatmul.mubr.f32.vlgmr.msra.gmra.mxu0 %v41_v17 }
  0xfd   :  { %v205_v18 = vpop.f32.mrf.mxu0 }
  0xfe   :  { %134 = vst [vmem:[#allocation7 + $0x8] sm:$0xff] %v205_v18 }
  0xff   :  { %v124_v19 = vpop.f32.mrf.mxu0 }
 0x100   :  { %133 = vst [vmem:[#allocation7] sm:$0xff] %v124_v19 }
 0x101   :  { %262 = shalt.err (!%p259_p0)
}
 0x102   :  { %146 = dma.vmem_to_hbm [thread:$0]  %s141_s1, 256, %s317_s2, [#allocation4], %s278_s12, %s278_s12, %s279_s13  }
 0x103   :  { %275 = dma.done.wait [#allocation4], 256  }
 0x104   :  { %276 = vsyncadd [#allocation4], 4294967040 }
 0x105   :  { %150 = vsyncpa [#allocation3], 1 }
 0x106   :  { %151 = vsyncpa [#allocation6], 1 }
 0x107   :  { %152 = vsyncpa [#allocation4], 1 }

</bundles_post_ra>
